<compile_context>
chip_gen: v6e
topology: v6e:2x2x1
jax: 0.10.0
libtpu: 0.0.40
codegen_flags: <defaults>
</compile_context>

<pallas_src>
import jax
import jax.numpy as jnp
from jax.experimental import pallas as pl
from jax.experimental.pallas import tpu as pltpu


def bert_embeddings_kernel(
    words_ref,    # (TILE_M, E) bf16  gathered word-embedding rows for this tile
    proj_ref,     # (E, H)      bf16  word_embeddings_2 weight (transposed, bias=False)
    pos_ref,      # (TILE_M, H) f32   position-embedding rows for this tile
    tok_ref,      # (TILE_M, 1) int32 token-type ids for this tile
    tok_emb_ref,  # (T, H)      f32   token-type table (T is tiny)
    gamma_ref,    # (1, H)      f32   LayerNorm weight
    beta_ref,     # (1, H)      f32   LayerNorm bias
    out_ref,      # (TILE_M, H) f32
):
    # ---- factorized E -> H projection on the MXU (bf16 operands, f32 acc) ----
    words = jnp.dot(words_ref[...], proj_ref[...],
                    preferred_element_type=jnp.float32)            # (TILE_M, H)

    # ---- token-type embedding: tiny T -> VPU masked sum, no MXU / one-hot ----
    tok_ids = tok_ref[...]                                         # (TILE_M, 1)
    T = tok_emb_ref.shape[0]
    tok_e = jnp.zeros_like(words)
    for t in range(T):                                             # unrolled, T is small
        row = tok_emb_ref[pl.ds(t, 1), :]                          # (1, H)
        mask = (tok_ids == t).astype(jnp.float32)                  # (TILE_M, 1)
        tok_e = tok_e + mask * row

    # ---- three-way add ----
    emb = words + pos_ref[...] + tok_e                             # (TILE_M, H)

    # ---- LayerNorm over the feature dim (BertLayerNorm, eps=1e-12) ----
    eps = 1e-12
    mean = jnp.mean(emb, axis=-1, keepdims=True)
    centered = emb - mean
    var = jnp.mean(centered * centered, axis=-1, keepdims=True)
    normed = centered * jax.lax.rsqrt(var + eps)                   # rsqrt -> EUP

    # Dropout is a no-op in eval mode.
    out_ref[...] = (normed * gamma_ref[...] + beta_ref[...]).astype(out_ref.dtype)


def _pick_divisor(n, candidates=(512, 256, 128, 64, 32, 16, 8)):
    for cand in candidates:
        if n % cand == 0:
            return cand
    return None


def bert_embeddings(input_ids, params, token_type_ids=None, position_ids=None):
    """input_ids: (B, S) int32.  Returns (B, S, H) float32."""
    B, S = input_ids.shape
    M = B * S

    word_emb = params["word_emb"]        # (V, E) f32
    proj = params["proj"]                # (E, H) f32
    pos_emb = params["pos_emb"]          # (P, H) f32
    tok_emb = params["tok_emb"]          # (T, H) f32
    gamma = params["gamma"]              # (1, H) f32
    beta = params["beta"]                # (1, H) f32
    E = word_emb.shape[1]
    H = pos_emb.shape[1]
    T = tok_emb.shape[0]

    # --- word-embedding gather in the wrapper (XLA gather; table stays in HBM),
    #     cast to bf16 so the per-tile DMA streams half the bytes.  The MXU
    #     consumes bf16 operands anyway; accumulation stays f32 in-kernel.
    ids = input_ids.reshape(M).astype(jnp.int32)
    words_e = jnp.take(word_emb, ids, axis=0).astype(jnp.bfloat16)  # (M, E) bf16
    proj_bf = proj.astype(jnp.bfloat16)                             # (E, H) bf16

    if token_type_ids is None:
        token_type_ids = jnp.zeros((B, S), jnp.int32)
    tok = token_type_ids.reshape(M, 1).astype(jnp.int32)             # (M, 1)

    # --- M-tiling ---------------------------------------------------------
    # Fast path: TILE_M divides S so each tile sits inside one sequence and
    # the default position rows are just a contiguous slice of pos_emb,
    # addressable directly through the BlockSpec index_map.
    tile_s = _pick_divisor(S)

    if position_ids is None and tile_s is not None:
        TILE_M = tile_s
        s_tiles = S // TILE_M
        pos_input = pos_emb                                          # (P, H)
        pos_spec = pl.BlockSpec((TILE_M, H), lambda i: (i % s_tiles, 0))
    else:
        # Fallback: arbitrary position_ids (or awkward S) -> gather rows in
        # the wrapper and stream (TILE_M, H) tiles like the other inputs.
        TILE_M = _pick_divisor(M) or M
        if position_ids is None:
            position_ids = jnp.broadcast_to(
                jnp.arange(S, dtype=jnp.int32)[None, :], (B, S))
        pos_input = jnp.take(
            pos_emb, position_ids.reshape(M).astype(jnp.int32), axis=0)  # (M, H)
        pos_spec = pl.BlockSpec((TILE_M, H), lambda i: (i, 0))

    grid = (M // TILE_M,)

    cost = pl.CostEstimate(
        flops=2 * M * E * H + 10 * M * H,
        transcendentals=M,
        bytes_accessed=(M * E * 2          # words_e (bf16)
                        + E * H * 2        # proj (bf16, resident)
                        + M * H * 4        # position rows
                        + T * H * 4        # token-type table
                        + 2 * H * 4        # gamma/beta
                        + M * 4            # token-type ids
                        + M * H * 4),      # output
    )

    out_flat = pl.pallas_call(
        bert_embeddings_kernel,
        out_shape=jax.ShapeDtypeStruct((M, H), jnp.float32),
        grid=grid,
        in_specs=[
            pl.BlockSpec((TILE_M, E), lambda i: (i, 0)),   # words_e tile (bf16)
            pl.BlockSpec((E, H), lambda i: (0, 0)),        # proj (bf16), resident
            pos_spec,                                      # position rows
            pl.BlockSpec((TILE_M, 1), lambda i: (i, 0)),   # token-type ids
            pl.BlockSpec((T, H), lambda i: (0, 0)),        # token-type table
            pl.BlockSpec((1, H), lambda i: (0, 0)),        # gamma
            pl.BlockSpec((1, H), lambda i: (0, 0)),        # beta
        ],
        out_specs=pl.BlockSpec((TILE_M, H), lambda i: (i, 0)),
        compiler_params=pltpu.CompilerParams(
            dimension_semantics=("parallel",),
            vmem_limit_bytes=64 * 1024 * 1024,
        ),
        cost_estimate=cost,
    )(words_e, proj_bf, pos_input, tok, tok_emb, gamma, beta)

    return out_flat.reshape(B, S, H)


def bert_embeddings_ref(input_ids, params, token_type_ids=None, position_ids=None,
                        eps=1e-12):
    """Pure-JAX f32 reference for correctness checking."""
    B, S = input_ids.shape
    if position_ids is None:
        position_ids = jnp.broadcast_to(
            jnp.arange(S, dtype=jnp.int32)[None, :], (B, S))
    if token_type_ids is None:
        token_type_ids = jnp.zeros_like(input_ids)
    words = jnp.take(params["word_emb"], input_ids, axis=0) @ params["proj"]
    pos = jnp.take(params["pos_emb"], position_ids, axis=0)
    tok = jnp.take(params["tok_emb"], token_type_ids, axis=0)
    emb = words + pos + tok
    mean = jnp.mean(emb, axis=-1, keepdims=True)
    var = jnp.mean((emb - mean) ** 2, axis=-1, keepdims=True)
    normed = (emb - mean) / jnp.sqrt(var + eps)
    return normed * params["gamma"][0] + params["beta"][0]


def init_params(key, vocab_size, embedding_size, hidden_size,
                max_position_embeddings, type_vocab_size):
    k1, k2, k3, k4 = jax.random.split(key, 4)
    word_emb = 0.02 * jax.random.normal(k1, (vocab_size, embedding_size), jnp.float32)
    # nn.Embedding(padding_idx=0): row 0 is zero at init
    word_emb = word_emb.at[0].set(0.0)
    # nn.Linear(E, H, bias=False) weight is (H, E); store transposed (E, H)
    proj = 0.02 * jax.random.normal(k2, (embedding_size, hidden_size), jnp.float32)
    pos_emb = 0.02 * jax.random.normal(
        k3, (max_position_embeddings, hidden_size), jnp.float32)
    tok_emb = 0.02 * jax.random.normal(
        k4, (type_vocab_size, hidden_size), jnp.float32)
    gamma = jnp.ones((1, hidden_size), jnp.float32)
    beta = jnp.zeros((1, hidden_size), jnp.float32)
    return dict(word_emb=word_emb, proj=proj, pos_emb=pos_emb,
                tok_emb=tok_emb, gamma=gamma, beta=beta)


if __name__ == "__main__":
    # Small ALBERT-like config: embedding_size != hidden_size -> factorized proj
    B, S = 2, 8
    vocab_size = 32
    embedding_size = 16
    hidden_size = 32
    max_position_embeddings = 16
    type_vocab_size = 2

    key = jax.random.PRNGKey(0)
    kp, ki, kt = jax.random.split(key, 3)
    params = init_params(kp, vocab_size, embedding_size, hidden_size,
                         max_position_embeddings, type_vocab_size)

    input_ids = jax.random.randint(ki, (B, S), 0, vocab_size, dtype=jnp.int32)
    token_type_ids = jax.random.randint(kt, (B, S), 0, type_vocab_size, dtype=jnp.int32)

    # Default position_ids (arange per row), matching the module's forward.
    out = bert_embeddings(input_ids, params, token_type_ids=token_type_ids)
    jax.block_until_ready(out)
    assert out.shape == (B, S, hidden_size)

    ref = bert_embeddings_ref(input_ids, params, token_type_ids=token_type_ids)
    max_err = float(jnp.max(jnp.abs(out - ref)))
    assert max_err < 2e-2, f"mismatch vs reference, max_err={max_err}"

    print("KERNEL_OK")
</pallas_src>

<mosaic_0001>
module attributes {stable_mosaic.version = 11 : i64} {
  func.func @bert_embeddings_kernel(%arg0: i32, %arg1: memref<8x16xbf16, #tpu.memory_space<vmem>>, %arg2: memref<16x32xbf16, #tpu.memory_space<vmem>>, %arg3: memref<8x32xf32, #tpu.memory_space<vmem>>, %arg4: memref<8x1xi32, #tpu.memory_space<vmem>>, %arg5: memref<2x32xf32, #tpu.memory_space<vmem>>, %arg6: memref<1x32xf32, #tpu.memory_space<vmem>>, %arg7: memref<1x32xf32, #tpu.memory_space<vmem>>, %arg8: memref<8x32xf32, #tpu.memory_space<vmem>>) attributes {dimension_semantics = [#tpu.dimension_semantics<parallel>], iteration_bounds = array<i64: 2>, scalar_prefetch = 0 : i64, scratch_operands = 0 : i64, tpu.core_type = #tpu.core_type<tc>, window_params = [{transform_indices = @transform_0, window_bounds = array<i64: 8, 16>}, {pipeline_mode = #tpu.pipeline_mode<synchronous>, transform_indices = @transform_1, window_bounds = array<i64: 16, 32>}, {transform_indices = @transform_2, window_bounds = array<i64: 8, 32>}, {transform_indices = @transform_3, window_bounds = array<i64: 8, 1>}, {pipeline_mode = #tpu.pipeline_mode<synchronous>, transform_indices = @transform_4, window_bounds = array<i64: 2, 32>}, {pipeline_mode = #tpu.pipeline_mode<synchronous>, transform_indices = @transform_5, window_bounds = array<i64: 1, 32>}, {pipeline_mode = #tpu.pipeline_mode<synchronous>, transform_indices = @transform_6, window_bounds = array<i64: 1, 32>}, {transform_indices = @transform_7, window_bounds = array<i64: 8, 32>}]} {
    %c0 = arith.constant 0 : index
    %c0_0 = arith.constant 0 : index
    %0 = vector.load %arg1[%c0, %c0_0] : memref<8x16xbf16, #tpu.memory_space<vmem>>, vector<8x16xbf16>
    %c0_1 = arith.constant 0 : index
    %c0_2 = arith.constant 0 : index
    %1 = vector.load %arg2[%c0_1, %c0_2] : memref<16x32xbf16, #tpu.memory_space<vmem>>, vector<16x32xbf16>
    %cst = arith.constant dense<0.000000e+00> : vector<8x32xf32>
    %2 = tpu.matmul %0, %1, %cst {dimension_numbers = #tpu.dot_dimension_numbers<[1], [0], [0], [1], [0, 0, 1, 1], [], []>} : vector<8x16xbf16>, vector<16x32xbf16>, vector<8x32xf32> -> vector<8x32xf32>
    %c0_3 = arith.constant 0 : index
    %c0_4 = arith.constant 0 : index
    %3 = vector.load %arg4[%c0_3, %c0_4] : memref<8x1xi32, #tpu.memory_space<vmem>>, vector<8x1xi32>
    %cst_5 = arith.constant 0.000000e+00 : f32
    %4 = vector.broadcast %cst_5 : f32 to vector<8x32xf32>
    %c0_6 = arith.constant 0 : index
    %c0_7 = arith.constant 0 : index
    %5 = vector.load %arg5[%c0_6, %c0_7] : memref<2x32xf32, #tpu.memory_space<vmem>>, vector<1x32xf32>
    %c0_i32 = arith.constant 0 : i32
    %6 = vector.broadcast %c0_i32 : i32 to vector<8x1xi32>
    %7 = arith.cmpi eq, %3, %6 : vector<8x1xi32>
    %8 = arith.extui %7 : vector<8x1xi1> to vector<8x1xi32>
    %9 = arith.sitofp %8 : vector<8x1xi32> to vector<8x1xf32>
    %10 = vector.broadcast %9 : vector<8x1xf32> to vector<8x32xf32>
    %11 = vector.broadcast %5 : vector<1x32xf32> to vector<8x32xf32>
    %12 = arith.mulf %10, %11 : vector<8x32xf32>
    %13 = arith.addf %4, %12 : vector<8x32xf32>
    %c1 = arith.constant 1 : index
    %c0_8 = arith.constant 0 : index
    %14 = vector.load %arg5[%c1, %c0_8] : memref<2x32xf32, #tpu.memory_space<vmem>>, vector<1x32xf32>
    %c1_i32 = arith.constant 1 : i32
    %15 = vector.broadcast %c1_i32 : i32 to vector<8x1xi32>
    %16 = arith.cmpi eq, %3, %15 : vector<8x1xi32>
    %17 = arith.extui %16 : vector<8x1xi1> to vector<8x1xi32>
    %18 = arith.sitofp %17 : vector<8x1xi32> to vector<8x1xf32>
    %19 = vector.broadcast %18 : vector<8x1xf32> to vector<8x32xf32>
    %20 = vector.broadcast %14 : vector<1x32xf32> to vector<8x32xf32>
    %21 = arith.mulf %19, %20 : vector<8x32xf32>
    %22 = arith.addf %13, %21 : vector<8x32xf32>
    %c0_9 = arith.constant 0 : index
    %c0_10 = arith.constant 0 : index
    %23 = vector.load %arg3[%c0_9, %c0_10] : memref<8x32xf32, #tpu.memory_space<vmem>>, vector<8x32xf32>
    %24 = arith.addf %2, %23 : vector<8x32xf32>
    %25 = arith.addf %24, %22 : vector<8x32xf32>
    %cst_11 = arith.constant dense<0.000000e+00> : vector<8xf32>
    %26 = vector.multi_reduction <add>, %25, %cst_11 [1] : vector<8x32xf32> to vector<8xf32>
    %27 = vector.shape_cast %26 : vector<8xf32> to vector<8x1xf32>
    %cst_12 = arith.constant 3.200000e+01 : f32
    %28 = vector.broadcast %cst_12 : f32 to vector<8x1xf32>
    %29 = arith.divf %27, %28 : vector<8x1xf32>
    %30 = vector.broadcast %29 : vector<8x1xf32> to vector<8x32xf32>
    %31 = arith.subf %25, %30 : vector<8x32xf32>
    %32 = arith.mulf %31, %31 : vector<8x32xf32>
    %cst_13 = arith.constant dense<0.000000e+00> : vector<8xf32>
    %33 = vector.multi_reduction <add>, %32, %cst_13 [1] : vector<8x32xf32> to vector<8xf32>
    %34 = vector.shape_cast %33 : vector<8xf32> to vector<8x1xf32>
    %cst_14 = arith.constant 3.200000e+01 : f32
    %35 = vector.broadcast %cst_14 : f32 to vector<8x1xf32>
    %36 = arith.divf %34, %35 : vector<8x1xf32>
    %cst_15 = arith.constant 9.99999996E-13 : f32
    %37 = vector.broadcast %cst_15 : f32 to vector<8x1xf32>
    %38 = arith.addf %36, %37 : vector<8x1xf32>
    %39 = math.rsqrt %38 : vector<8x1xf32>
    %40 = vector.broadcast %39 : vector<8x1xf32> to vector<8x32xf32>
    %41 = arith.mulf %31, %40 : vector<8x32xf32>
    %c0_16 = arith.constant 0 : index
    %c0_17 = arith.constant 0 : index
    %42 = vector.load %arg6[%c0_16, %c0_17] : memref<1x32xf32, #tpu.memory_space<vmem>>, vector<1x32xf32>
    %43 = vector.broadcast %42 : vector<1x32xf32> to vector<8x32xf32>
    %44 = arith.mulf %41, %43 : vector<8x32xf32>
    %c0_18 = arith.constant 0 : index
    %c0_19 = arith.constant 0 : index
    %45 = vector.load %arg7[%c0_18, %c0_19] : memref<1x32xf32, #tpu.memory_space<vmem>>, vector<1x32xf32>
    %46 = vector.broadcast %45 : vector<1x32xf32> to vector<8x32xf32>
    %47 = arith.addf %44, %46 : vector<8x32xf32>
    %c0_20 = arith.constant 0 : index
    %c0_21 = arith.constant 0 : index
    %48 = vector.load %arg8[%c0_20, %c0_21] : memref<8x32xf32, #tpu.memory_space<vmem>>, vector<8x32xf32>
    tpu.vector_store %arg8[%c0_20, %c0_21], %47 {strides = array<i32>} : memref<8x32xf32, #tpu.memory_space<vmem>>, vector<8x32xf32>,
    return
  }
  func.func @transform_0(%arg0: i32) -> (i32, i32) {
    %c0_i32 = arith.constant 0 : i32
    %c0_i32_0 = arith.constant 0 : i32
    return %arg0, %c0_i32 : i32, i32
  }
  func.func @transform_1(%arg0: i32) -> (i32, i32) {
    %c0_i32 = arith.constant 0 : i32
    %c0_i32_0 = arith.constant 0 : i32
    %c0_i32_1 = arith.constant 0 : i32
    return %c0_i32, %c0_i32_0 : i32, i32
  }
  func.func @transform_2(%arg0: i32) -> (i32, i32) {
    %c1_i32 = arith.constant 1 : i32
    %c0_i32 = arith.constant 0 : i32
    %0 = arith.cmpi eq, %c1_i32, %c0_i32 : i32
    %c1_i32_0 = arith.constant 1 : i32
    %1 = arith.select %0, %c1_i32_0, %c1_i32 : i32
    %2 = arith.remsi %arg0, %1 : i32
    %c0_i32_1 = arith.constant 0 : i32
    %3 = arith.cmpi ne, %2, %c0_i32_1 : i32
    %c0_i32_2 = arith.constant 0 : i32
    %4 = arith.cmpi slt, %2, %c0_i32_2 : i32
    %c0_i32_3 = arith.constant 0 : i32
    %5 = arith.cmpi slt, %1, %c0_i32_3 : i32
    %6 = arith.xori %4, %5 : i1
    %7 = arith.andi %6, %3 : i1
    %8 = arith.addi %2, %1 : i32
    %9 = arith.select %7, %8, %2 : i32
    %c0_i32_4 = arith.constant 0 : i32
    %c0_i32_5 = arith.constant 0 : i32
    return %9, %c0_i32_4 : i32, i32
  }
  func.func @transform_3(%arg0: i32) -> (i32, i32) {
    %c0_i32 = arith.constant 0 : i32
    %c0_i32_0 = arith.constant 0 : i32
    return %arg0, %c0_i32 : i32, i32
  }
  func.func @transform_4(%arg0: i32) -> (i32, i32) {
    %c0_i32 = arith.constant 0 : i32
    %c0_i32_0 = arith.constant 0 : i32
    %c0_i32_1 = arith.constant 0 : i32
    return %c0_i32, %c0_i32_0 : i32, i32
  }
  func.func @transform_5(%arg0: i32) -> (i32, i32) {
    %c0_i32 = arith.constant 0 : i32
    %c0_i32_0 = arith.constant 0 : i32
    %c0_i32_1 = arith.constant 0 : i32
    return %c0_i32, %c0_i32_0 : i32, i32
  }
  func.func @transform_6(%arg0: i32) -> (i32, i32) {
    %c0_i32 = arith.constant 0 : i32
    %c0_i32_0 = arith.constant 0 : i32
    %c0_i32_1 = arith.constant 0 : i32
    return %c0_i32, %c0_i32_0 : i32, i32
  }
  func.func @transform_7(%arg0: i32) -> (i32, i32) {
    %c0_i32 = arith.constant 0 : i32
    %c0_i32_0 = arith.constant 0 : i32
    return %arg0, %c0_i32 : i32, i32
  }
}

</mosaic_0001>

<bundles_post_ra>
// kernel: tpu_custom_call.1
= control target key start
LH: loop header
LB: loop body
LE: loop exit
PB: predicated region body
PF: predicated region fallthrough
CT: control target
= control target key end

     0   :  { %s1003_s0 = inlined_call_operand.hbm [shape: bf16[16,16], index: 0, kind: input, shape index: {}]   ;;  %s1004_s1 = inlined_call_operand.hbm [shape: bf16[16,32], index: 1, kind: input, shape index: {}]   ;;  %s1005_s2 = inlined_call_operand.vmem [shape: f32[16,32], index: 2, kind: input, shape index: {}]   ;;  %s1006_s3 = inlined_call_operand.vmem [shape: s32[16,1], index: 3, kind: input, shape index: {}]   ;;  %s1007_s4 = inlined_call_operand.vmem [shape: f32[2,32], index: 4, kind: input, shape index: {}]   ;;  %s1008_s5 = inlined_call_operand.vmem [shape: f32[1,32], index: 5, kind: input, shape index: {}]   ;;  %s1009_s6 = inlined_call_operand.vmem [shape: f32[1,32], index: 6, kind: input, shape index: {}]   ;;  %s1010_s7 = inlined_call_operand.hbm [shape: f32[16,32], index: 7, kind: output, shape index: {}]  }
   0x1   :  { %1015 = sst [smem:[#allocation12_spill]] %s1004_s1 }
   0x2   :  { %12 = vsyncpa [#allocation3], 0 }
   0x3   :  { %14 = vsyncpa [#allocation3 + $0x1], 0 }
   0x4   :  { %15 = vsyncpa [#allocation6], 0 }
   0x5   :  { %16 = vsyncpa [#allocation4], 0 }
   0x6   :  { %18 = vsyncpa [#allocation4 + $0x1], 0  ;;  %s825_s24 = smov 0   ;;  %s827_s25 = smov 0  }
   0x7   :  { %s829_s26 = smov 0   ;;  %s831_s27 = smov 0  }
   0x8 LB: > { %s846_s28 = sadd.s32 4294967295, %s775_s27   ;;  %s551_s29 = sadd.s32 4294967294, %s775_s27   ;;  %s775_s27 = sphi %s831_s27, %s1036_s27   ;;  %s771_s26 = sphi %s829_s26, %s1035_s26   ;;  %s767_s25 = sphi %s827_s25, %s1034_s25   ;;  %s763_s24 = sphi %s825_s24, %s1033_s24  }
   0x9   : > { %p44_p0 = scmp.ne.s32.totalorder %s767_s25, %s763_s24  ;;  %p1011_p1 = scmp.eq.s32.totalorder %s846_s28, 0 }
   0xa   : > { %p205_p3 = scmp.eq.s32.totalorder %s551_s29, 1  ;;  %p552_p5 = scmp.ge.s32.totalorder %s775_s27, 1 }
   0xb   : > { %p855_p4 = por %p1011_p1, %p44_p0  ;;  %p212_p7 = scmp.lt.s32.totalorder %s775_s27, 3 }
   0xc   : > { %p860_p6 = por %p205_p3, %p44_p0  ;;  %s777_s10 = smov [#allocation5]  }
   0xd   : > { %s1016_s30 = scalar_select %p855_p4, 1, 0 }
   0xe   : > { %s1017_s8 = scalar_select %p860_p6, 1, 0 }
   0xf   : > { %p865_p8 = pnand %p552_p5, %p212_p7  ;;  %s224_s11 = sshll.u32 %s777_s10, 4  ;;  %s225_s11 = int_to_ptr.vmem [resolvable:$true] %s224_s11 }
  0x10   : > { %s879_s13 = sadd.s32 1, %s775_s27   ;;  %s31_s14 = sadd.s32 1, %s771_s26 }
  0x11   : > { %s1018_s9 = scalar_select %p865_p8, 1, 0 }
  0x12   : > { %p590_p9 = pneg %p865_p8  ;;  %s28_s15 = ssub.s32 %s775_s27, %s879_s13 }
  0x13   : > { %s664_s16 = scalar_lea.vmem %s225_s11, 128  ;;  %p672_p5 = scmp.lt.s32.totalorder %s225_s11, %s225_s11 }
  0x14   : > { %p874_p11 = pnand %p590_p9, %p1011_p1  ;;  %p665_p13 = scmp.ne.s32.totalorder %s225_s11, %s664_s16 }
  0x15   : > { %p673_p7 = scmp.lt.s32.totalorder %s664_s16, %s664_s16 }
  0x16   : > { %p655_p12 = pneg %p874_p11 }
  0x17   : > { %p674_p10 = por %p673_p7, %p672_p5 }
  0x18   : > { %p667_p0 = pnand %p665_p13, %p655_p12 }
  0x1a   : > { %p668_p3 = pneg %p667_p0 }
  0x1c   : > { %p675_p2 = pnand %p674_p10, %p668_p3 }
  0x1e   : > { %678 = shalt.err (!%p675_p2)
}
  0x1f   : > { %s778_s17 = smov 64   ;;  %s779_s18 = smov 4  }
  0x20   : > { %s1020_s1 = sld [smem:[#allocation12_spill]]  ;;  %p29_p9 = scmp.eq.s32.totalorder %s28_s15, 0 }
  0x21   : > { %p38_p12 = scmp.ne.s32.totalorder %s771_s26, %s767_s25  ;;  %p39_p10 = scmp.eq.s32.totalorder %s775_s27, 0 }
  0x22   : > { %p603_p2 = scmp.lt.s32.totalorder %s775_s27, 2  ;;  %p1022_p0 = scmp.eq.s32.totalorder %s846_s28, 1 }
  0x23   : > { %s896_s21 = scalar_select %p29_p9, %s771_s26, %s31_s14  }
  0x24   : > { %p40_p13 = por %p39_p10, %p38_p12  ;;  %p900_p3 = por %p1022_p0, %p38_p12 }
  0x25   : > { %1021 = sst [smem:[#allocation11_spill]] %s896_s21  ;;  %s250_s23 = sand.u32 1, %s771_s26  }
  0x26   : > { %593 = dma.hbm_to_vmem [thread:$0]  (!%p874_p11), %s1020_s1, 128, %s225_s11, [#allocation6], %s778_s17, %s778_s17, %s779_s18  }
  0x27   : > { %s1023_s22 = scalar_select %p900_p3, 1, 0 }
  0x28   : > { %s556_s29 = sshll.u32 %s775_s27, 6  ;;  %s555_s10 = sshll.u32 %s250_s23, 2 }
  0x29   : > { %s909_s19 = scalar_lea.hbm %s1003_s0, %s556_s29  ;;  %s254_s11 = scalar_lea.vmem [#allocation2], %s555_s10 }
  0x2a   : > { %s261_s14 = sshll.u32 %s254_s11, 4  ;;  %p911_p11 = pnand %p603_p2, %p40_p13  ;;  %s262_s14 = int_to_ptr.vmem [resolvable:$true] %s261_s14 }
  0x2b   : > { %s251_s17 = scalar_lea.sflag [#allocation3], %s250_s23  ;;  %s679_s18 = scalar_lea.hbm %s909_s19, 64 }
  0x2c   : > { %p680_p5 = scmp.ne.s32.totalorder %s909_s19, %s679_s18  ;;  %p681_p7 = pneg %p911_p11 }
  0x2d   : > { %s684_s12 = scalar_lea.hbm %s1003_s0, 128  ;;  %p685_p10 = scmp.lt.s32.totalorder %s909_s19, %s1003_s0 }
  0x2e   : > { %p682_p9 = pnand %p681_p7, %p680_p5  ;;  %p686_p2 = scmp.lt.s32.totalorder %s684_s12, %s679_s18 }
  0x30   : > { %p683_p12 = pneg %p682_p9  ;;  %p687_p13 = por %p686_p2, %p685_p10 }
  0x32   : > { %p688_p0 = pnand %p687_p13, %p683_p12 }
  0x34   : > { %691 = shalt.err (!%p688_p0)
}
  0x35   : > { %s692_s11 = scalar_lea.vmem %s262_s14, 64  ;;  %s780_s23 = smov [#allocation2]  }
  0x36   : > { %p693_p1 = scmp.ne.s32.totalorder %s262_s14, %s692_s11  ;;  %s697_s1 = sshll.u32 %s780_s23, 4  ;;  %s698_s1 = int_to_ptr.vmem [resolvable:$false] %s697_s1 }
  0x37   : > { %s699_s21 = scalar_lea.vmem %s698_s1, 128  ;;  %p700_p5 = scmp.lt.s32.totalorder %s262_s14, %s698_s1 }
  0x38   : > { %p695_p6 = pnand %p693_p1, %p681_p7  ;;  %p701_p9 = scmp.lt.s32.totalorder %s699_s21, %s692_s11 }
  0x3a   : > { %p696_p3 = pneg %p695_p6  ;;  %p702_p4 = por %p701_p9, %p700_p5 }
  0x3c   : > { %p703_p8 = pnand %p702_p4, %p696_p3 }
  0x3e   : > { %706 = shalt.err (!%p703_p8)
}
  0x3f   : > { %597 = dma.hbm_to_vmem [thread:$0]  (!%p911_p11), %s909_s19, 64, %s262_s14, %s251_s17  }
  0x40   : > { %p1025_p12 = scmp.ne.s32.totalorder %s1018_s9, 0 }
  0x41   : > { %s932_s18 = sand.u32 (!%p1025_p12), 1, %s767_s25   ;;  %p1026_p1 = scmp.ne.s32.totalorder (!%p1025_p12), %s1016_s30, 0 }
  0x42   : > { %277 = sbr.rel (%p1025_p12) target bundleno = 598 (0x256), region = 48  ;;  %s558_s20 = sshll.u32 (!%p1025_p12), %s932_s18, 2 }
  0x43   : > { %s280_s29 = scalar_lea.sflag (!%p1025_p12), [#allocation3], %s932_s18  ;;  %s283_s1 = scalar_lea.vmem (!%p1025_p12), [#allocation2], %s558_s20 }
  0x47   : > { %750 = dma.done.wait (%p1026_p1), %s280_s29, 64  }
  0x48   : > { %752 = vsyncadd (%p1026_p1), %s280_s29, 4294967232  ;;  %p1027_p4 = scmp.eq.s32.totalorder %s846_s28, 0 }
  0x4a   : > { %754 = dma.done.wait (%p1027_p4), [#allocation6], 128   ;;  %p1028_p6 = pmov %p1027_p4 }
  0x4b   : > { %v781_v0 = vmov 0.0   ;;  %vm782_vm0 = vmmov 0   ;;  %p322_p8 = scmp.lt.s32.totalorder %s846_s28, 1  ;;  %v783_v1 = vmov 0   ;;  %v650_v2 = vld [vmem:[#allocation5] sm:$0xff]   ;;  %vm368_vm1 = vcmask 130048  }
  0x4c   : > { %756 = vsyncadd (%p1028_p6), [#allocation6], 4294967168  ;;  %576 = vmatprep.subr.bf16.mxu0 %v781_v0  ;;  %578 = vmatprep.mubr.msk.bf16.mxu0 %vm782_vm0, %v781_v0  ;;  %v327_v4 = vld [vmem:[%s283_s1] sm:$0xf]  ;;  %vm413_vm4 = vcmask 261120   ;;  %s560_s23 = sshll.u32 %s932_s18, 3 }
  0x4d   : > { %644 = vset.pattern.permute.xlu0 %v783_v1  ;;  %s323_s9 = scalar_select %p322_p8, %s846_s28, 1  ;;  %577 = vmatpush3.bf16.msra.mxu0 %v650_v2  ;;  %v563_v11 = vld [vmem:[%s1007_s4] ss:$0 sm:$0xff]  ;;  %v565_v12 = vld [vmem:[%s1007_s4 + $0x1] ss:$0 sm:$0xff] }
  0x4e   : > { %v361_v15 = vld [vmem:[%s1005_s2] sm:$0xff]  ;;  %s321_s19 = scalar_lea.vmem [#allocation7], %s560_s23  ;;  %s446_s12 = scalar_lea.sflag [#allocation4], %s932_s18 }
  0x4f   : > { %s561_s21 = sshll.u32 %s323_s9, 3  ;;  %v568_v33 = vld [vmem:[%s1008_s5] ss:$0 sm:$0xff]  ;;  %s459_s30 = sshll.u32 %s321_s19, 4  ;;  %s460_s30 = int_to_ptr.vmem [resolvable:$true] %s459_s30 }
  0x50   : > { %s325_s14 = scalar_lea.vmem %s1006_s3, %s561_s21  ;;  %579 = vmatmul.mubr.msk.bf16.vlgmr.msra.gmra.mxu0 %vm368_vm1, %v327_v4  ;;  %v569_v35 = vld [vmem:[%s1009_s6] ss:$0 sm:$0xff]  ;;  %s571_s21 = sshll.u32 %s846_s28, 7 }
  0x51   : > { %v330_v3 = vld [vmem:[%s325_s14] sm:$0xff]  ;;  %s457_s17 = scalar_lea.hbm %s1010_s7, %s571_s21  ;;  %s707_s16 = scalar_lea.vmem %s460_s30, 128 }
  0x52   : > { %vm332_vm2 = vcmp.eq.s32.totalorder %v330_v3, 0  ;;  %vm347_vm3 = vcmp.eq.s32.totalorder %v330_v3, 1  ;;  %p708_p3 = scmp.ne.s32.totalorder %s460_s30, %s707_s16  ;;  %p1029_p11 = scmp.ne.s32.totalorder %s1023_s22, 0 }
  0x53   : > { %v562_v5 = vsel %vm332_vm2, 1.0, %v781_v0  ;;  %v564_v6 = vsel %vm347_vm3, 1.0, %v781_v0  ;;  %s784_s10 = smov [#allocation7]  }
  0x54   : > { %v645_v7 = vpack.i.bf16 %v564_v6, %v562_v5  ;;  %p709_p7 = pnand %p708_p3, %p1029_p11  ;;  %s711_s11 = sshll.u32 %s784_s10, 4  ;;  %s712_s11 = int_to_ptr.vmem [resolvable:$false] %s711_s11 }
  0x55   : > { %s713_s28 = scalar_lea.vmem %s712_s11, 256  ;;  %p714_p2 = scmp.lt.s32.totalorder %s460_s30, %s712_s11 }
  0x56   : > { %646 = vperm.xlu0 %644, %v645_v7   ;;  %p710_p10 = pneg %p709_p7  ;;  %p715_p13 = scmp.lt.s32.totalorder %s713_s28, %s707_s16 }
  0x58   : > { %p716_p0 = por %p715_p13, %p714_p2 }
  0x5a   : > { %p717_p5 = pnand %p716_p0, %p710_p10 }
  0xd1   : > { %v647_v8 = vpop.permute.xlu0 %646 }
  0xd2   : > { %v649_v9 = vunpack.i.h.bf16 %v647_v8  ;;  %v648_v10 = vunpack.i.l.bf16 %v647_v8 }
  0xd4   : > { %v359_v13 = vmul.f32 %v649_v9, %v565_v12  ;;  %v344_v14 = vmul.f32 %v648_v10, %v563_v11 }
  0xd6   : > { %v360_v16 = vadd.f32 %v359_v13, %v344_v14 }
 0x110   : > { %v406_v17 = vpop.f32.mrf.mxu0 }
 0x111   : > { %v407_v18 = vadd.f32 %v406_v17, %v361_v15 }
 0x112   : > { %v580_v19 = vpop.f32.mrf.mxu0 }
 0x113   : > { %v412_v20 = vadd.f32 %v407_v18, %v360_v16 }
 0x114   : > { %v409_v21 = vpop.f32.mrf.mxu0 }
 0x115   : > { %v414_v22 = vsel %vm413_vm4, %v412_v20, 0.0 }
 0x116   : > { %415 = vadd.xlane.f32.xlu0 %v414_v22  ;;  %v581_v23 = vpop.f32.mrf.mxu0 }
 0x19f   : > { %v416_v24 = vpop.xlane.xlu0 %415 }
 0x1a0   : > { %v418_v25 = vmul.f32 0.03125, %v416_v24 }
 0x1a2   : > { %v419_v26 = vsub.f32 %v412_v20, %v418_v25 }
 0x1a4   : > { %v420_v27 = vmul.f32 %v419_v26, %v419_v26 }
 0x1a6   : > { %v421_v28 = vsel %vm413_vm4, %v420_v27, 0.0 }
 0x1a7   : > { %422 = vadd.xlane.f32.xlu1 %v421_v28 }
 0x230   : > { %v423_v29 = vpop.xlane.xlu1 %422 }
 0x231   : > { %v424_v30 = vmul.f32 0.03125, %v423_v29 }
 0x233   : > { %v425_v31 = vadd.f32 1e-12, %v424_v30 }
 0x235   : > { %651 = vrsqrt.f32 %v425_v31 }
 0x242   : > { %v652_v32 = vpop.eup %651 }
 0x243   : > { %v427_v34 = vmul.f32 %v652_v32, %v419_v26 }
 0x245   : > { %v435_v36 = vmul.f32 %v568_v33, %v427_v34 }
 0x247   : > { %v443_v37 = vadd.f32 %v569_v35, %v435_v36 }
 0x249   : > { %444 = vst.msk [vmem:[%s321_s19] sm:$0xff] %vm413_vm4, %v443_v37 }
 0x24a   : > { %720 = shalt.err (!%p717_p5)
}
 0x24b   : > { %s721_s23 = scalar_lea.hbm %s457_s17, 128  ;;  %s725_s29 = scalar_lea.hbm %s1010_s7, 256 }
 0x24c   : > { %p722_p9 = scmp.ne.s32.totalorder %s457_s17, %s721_s23  ;;  %p726_p4 = scmp.lt.s32.totalorder %s457_s17, %s1010_s7 }
 0x24d   : > { %p727_p6 = scmp.lt.s32.totalorder %s725_s29, %s721_s23 }
 0x24e   : > { %p723_p12 = pnand %p722_p9, %p1029_p11 }
 0x24f   : > { %p728_p8 = por %p727_p6, %p726_p4 }
 0x250   : > { %p724_p1 = pneg %p723_p12 }
 0x252   : > { %p729_p3 = pnand %p728_p8, %p724_p1 }
 0x254   : > { %732 = shalt.err (!%p729_p3)
}
 0x255   : > { %588 = dma.vmem_to_hbm [thread:$0]  (%p1029_p11), %s460_s30, 128, %s457_s17, %s446_s12  }
 0x256 PF: > { %s471_s21 = sand.u32 1, %s763_s24   ;;  %p1030_p7 = scmp.ne.s32.totalorder %s1017_s8, 0 }
 0x257   : > { %p1031_p10 = scmp.ge.s32.totalorder %s775_s27, 2  ;;  %s472_s19 = scalar_lea.sflag [#allocation4], %s471_s21 }
 0x259   : > { %p599_p2 = pnand %p1031_p10, %p1030_p7 }
 0x25b   : > { %p600_p13 = pneg %p599_p2 }
 0x25d   : > { %758 = dma.done.wait (%p600_p13), %s472_s19, 128  }
 0x25e   : > { %760 = vsyncadd (%p600_p13), %s472_s19, 4294967168  ;;  %s1032_s14 = sld [smem:[#allocation11_spill]]  ;;  %p21_p0 = scmp.ge.s32.totalorder %s879_s13, 4  }
 0x25f   : > { %s1033_s24 = smov %s767_s25  ;;  %s1034_s25 = smov %s771_s26 }
 0x260   : > { %s1036_s27 = smov %s879_s13  ;;  %23 = sbr.rel (!%p21_p0) target bundleno = 8 (0x8), region = 100 }
 0x264   : > { %s1035_s26 = smov %s1032_s14 }
 0x265   :  { %477 = vsyncpa [#allocation3], 1 }
 0x266   :  { %479 = vsyncpa [#allocation3 + $0x1], 1 }
 0x267   :  { %480 = vsyncpa [#allocation6], 1 }
 0x268   :  { %481 = vsyncpa [#allocation4], 1 }
 0x269   :  { %483 = vsyncpa [#allocation4 + $0x1], 1 }

</bundles_post_ra>
